<compile_context>
chip_gen: v7x
topology: tpu7x:2x2x1
jax: 0.10.0
libtpu: 0.0.40
codegen_flags: <defaults>
</compile_context>

<pallas_src>
import functools
import math

import jax
import jax.numpy as jnp
from jax import lax
from jax.experimental import pallas as pl
from jax.experimental.pallas import tpu as pltpu


def _layernorm(x, gamma, beta, eps=1e-5):
    # PyTorch nn.LayerNorm: biased variance, eps inside the sqrt.
    mu = jnp.mean(x, axis=-1, keepdims=True)
    var = jnp.mean((x - mu) ** 2, axis=-1, keepdims=True)
    return (x - mu) * lax.rsqrt(var + eps) * gamma + beta


def _gelu_exact(x):
    # F.gelu default = exact (erf-based) GELU.
    return 0.5 * x * (1.0 + lax.erf(x * (1.0 / math.sqrt(2.0))))


def _make_mab_kernel(num_heads, return_attn):
    def kernel(q_ref, k_ref,
               wq_ref, bq_ref, wkv_ref, bkv_ref,
               wo_ref, bo_ref, g0_ref, beta0_ref, g1_ref, beta1_ref,
               *out_refs):
        o_ref = out_refs[0]
        a_ref = out_refs[1] if return_attn else None

        tb, tq, dim_q = q_ref.shape
        _, nk, dim_k = k_ref.shape
        dim_v = wq_ref.shape[1]
        ds = dim_v // num_heads
        f32 = jnp.float32
        bf16 = jnp.bfloat16

        # Fold the (batch, seq) tile into the sublane (row) axis once; every
        # projection is a single fused MXU matmul (bf16 inputs, f32 acc).
        xq = q_ref[...].reshape(tb * tq, dim_q).astype(bf16)
        xk = k_ref[...].reshape(tb * nk, dim_k).astype(bf16)

        # fc_q.  Kept in f32 lane-major form: it is reused directly for the
        # residual (the 1/sqrt(dim_V) score scale lives in the K weights, so
        # q is unscaled).
        q = jnp.dot(xq, wq_ref[...], preferred_element_type=f32) + bq_ref[...]
        # fc_k and fc_v fused into one matmul: (tb*Nk, 2*dim_V).
        kv = jnp.dot(xk, wkv_ref[...], preferred_element_type=f32) + bkv_ref[...]

        # Only bf16 copies go through the head-split relayout (halves XLU bytes).
        q_bf = q.astype(bf16)
        kv_bf = kv.astype(bf16)

        def split_heads(x_bf, seq, lane_off):
            # (tb*seq, lanes) -> (num_heads*tb, seq, ds), head-major so the
            # flat head*batch ordering matches torch.cat(X.split(ds, 2), dim=0).
            parts = [x_bf[:, lane_off + h * ds: lane_off + (h + 1) * ds]
                     for h in range(num_heads)]
            return jnp.stack(parts, axis=0).reshape(num_heads * tb, seq, ds)

        qh = split_heads(q_bf, tq, 0)
        kh = split_heads(kv_bf, nk, 0)        # already scaled by 1/sqrt(dim_V)
        vh = split_heads(kv_bf, nk, dim_v)

        # All heads / all batch rows of this tile in ONE batched matmul.
        s = jnp.einsum('bqd,bkd->bqk', qh, kh, preferred_element_type=f32)
        s = s - jnp.max(s, axis=-1, keepdims=True)
        e = jnp.exp(s)
        a = e * pl.reciprocal(jnp.sum(e, axis=-1, keepdims=True), approx=True)

        if return_attn:
            # Free reshape: (H*tb, tq, nk) -> (H, tb, tq, nk); the HBM array
            # (H, B, Nq, Nk) reshapes for free to torch's (H*B, Nq, Nk).
            a_ref[...] = a.reshape(num_heads, tb, tq, nk).astype(a_ref.dtype)

        av = jnp.einsum('bqk,bkd->bqd', a.astype(bf16), vh,
                        preferred_element_type=f32)
        av = av.reshape(num_heads, tb * tq, ds)

        # Re-assemble heads in-register on the lane axis (no narrow masked
        # stores, no store->load round trip), residual in lane-major space.
        av_lanes = jnp.concatenate([av[h] for h in range(num_heads)], axis=-1)
        o = q + av_lanes
        o = _layernorm(o, g0_ref[...], beta0_ref[...])                 # ln0
        ff = _gelu_exact(jnp.dot(o.astype(bf16), wo_ref[...],
                                 preferred_element_type=f32) + bo_ref[...])
        out = _layernorm(o + ff, g1_ref[...], beta1_ref[...])          # ln1
        # Single full-width, lane-dense store of the output block.
        o_ref[...] = out.reshape(tb, tq, dim_v).astype(o_ref.dtype)

    return kernel


def _chip_info():
    """(multi_tensorcore, vmem_capacity_bytes) -- generation-aware, with safe fallbacks."""
    try:
        kind = jax.devices()[0].device_kind.lower()
    except Exception:
        kind = ""
    multi_tc = "v7" in kind            # only v7x has 2 TensorCores per chip
    vmem_bytes = None
    try:
        info = pltpu.get_tpu_info()
        vmem_bytes = int(getattr(info, "vmem_capacity_bytes", 0)) or None
    except Exception:
        vmem_bytes = None
    if vmem_bytes is None:
        vmem_bytes = (64 << 20) if multi_tc else (128 << 20)
    return multi_tc, vmem_bytes


def _divisors(n):
    return [d for d in range(1, n + 1) if n % d == 0]


def _pick_tiles(B, Nq, Nk, dim_Q, dim_K, dim_V, num_heads, multi_tc,
                vmem_bytes, attn_itemsize):
    """Divisor search for (tb, tq): maximize rows per step within a VMEM
    budget; insist on >=2 grid steps only on multi-TensorCore chips."""
    budget = int(0.55 * vmem_bytes)

    def step_bytes(tb, tq):
        rq, rk = tb * tq, tb * Nk
        b = 2 * 4 * tb * (tq * dim_Q + Nk * dim_K)        # Q/K input blocks (x2 buf)
        b += 2 * 4 * rq * dim_V                           # O output block (x2 buf)
        b += 2 * attn_itemsize * num_heads * rq * Nk      # A output block (x2 buf)
        b += 6 * (rq * dim_V + rk * 2 * dim_V)            # f32 proj + bf16 copies/splits
        b += 3 * 4 * num_heads * rq * Nk                  # scores / exp / softmax (f32)
        b += 8 * rq * dim_V                               # AV + epilogue temporaries
        b += 4 * (dim_Q + 2 * dim_K + dim_V + 8) * dim_V  # weights/bias/LN (bf16, x2 buf)
        return b

    # Mosaic block rule: only tq sits in a second-to-last block dim, so it
    # must be a multiple of 8 or equal to Nq.  tb is unconstrained.
    tq_cands = [d for d in _divisors(Nq) if d == Nq or d % 8 == 0]
    tb_cands = _divisors(B)

    best_key, best = None, None
    for tq in tq_cands:
        for tb in tb_cands:
            sb = step_bytes(tb, tq)
            fits = sb <= budget
            steps = (B // tb) * (Nq // tq)
            par_ok = (not multi_tc) or steps >= 2
            rows = tb * tq
            # Feasible first; megacore-friendly second (v7x only); then the
            # biggest tile (measured: bigger tiles -> better HBM roofline).
            key = (fits, par_ok, rows if fits else -rows)
            if best_key is None or key > best_key:
                best_key, best = key, (tb, tq, sb)
    return best


@functools.partial(jax.jit,
                   static_argnames=("num_heads", "return_attn", "attn_dtype"))
def mab_forward(params, Q, K, *, num_heads, return_attn=True,
                attn_dtype=jnp.float32):
    B, Nq, dim_Q = Q.shape
    _, Nk, dim_K = K.shape
    dim_V = params["wq"].shape[1]
    assert dim_V % num_heads == 0

    f32 = jnp.float32
    bf16 = jnp.bfloat16
    scale = 1.0 / math.sqrt(dim_V)

    multi_tc, vmem_bytes = _chip_info()
    attn_itemsize = jnp.dtype(attn_dtype).itemsize if return_attn else 0
    tb, tq, footprint = _pick_tiles(B, Nq, Nk, dim_Q, dim_K, dim_V, num_heads,
                                    multi_tc, vmem_bytes, attn_itemsize)
    grid = (B // tb, Nq // tq)

    # Generation-aware scoped-VMEM request consistent with the tiler:
    # ~footprint x2 headroom, capped at physical minus a 16 MiB reserve
    # (~48 MiB on v7x, ~112 MiB on v5e/v6e).
    cap = max(vmem_bytes - (16 << 20), 32 << 20)
    vmem_limit = int(min(cap, max(32 << 20, 2 * footprint)))

    # Host-side prep: bf16 weights (half the weight DMA), fc_k|fc_v fused into
    # one (dim_K, 2*dim_V) weight, attention scale folded into the K half.
    wq = params["wq"].astype(bf16)
    wkv = jnp.concatenate([params["wk"] * scale, params["wv"]],
                          axis=1).astype(bf16)
    bkv = jnp.concatenate([params["bk"] * scale, params["bv"]],
                          axis=1).astype(f32)
    wo = params["wo"].astype(bf16)

    def const_spec(shape):
        return pl.BlockSpec(shape, lambda gb, gq: (0,) * len(shape))

    in_specs = [
        pl.BlockSpec((tb, tq, dim_Q), lambda gb, gq: (gb, gq, 0)),       # Q
        pl.BlockSpec((tb, Nk, dim_K), lambda gb, gq: (gb, 0, 0)),        # K
        const_spec((dim_Q, dim_V)), const_spec((1, dim_V)),              # fc_q
        const_spec((dim_K, 2 * dim_V)), const_spec((1, 2 * dim_V)),      # fc_k|v
        const_spec((dim_V, dim_V)), const_spec((1, dim_V)),              # fc_o
        const_spec((1, dim_V)), const_spec((1, dim_V)),                  # ln0
        const_spec((1, dim_V)), const_spec((1, dim_V)),                  # ln1
    ]
    out_specs = [pl.BlockSpec((tb, tq, dim_V), lambda gb, gq: (gb, gq, 0))]
    out_shape = [jax.ShapeDtypeStruct((B, Nq, dim_V), f32)]
    if return_attn:
        out_specs.append(
            pl.BlockSpec((num_heads, tb, tq, Nk), lambda gb, gq: (0, gb, gq, 0)))
        out_shape.append(
            jax.ShapeDtypeStruct((num_heads, B, Nq, Nk), attn_dtype))

    kernel = _make_mab_kernel(num_heads, return_attn)
    outs = pl.pallas_call(
        kernel,
        grid=grid,
        in_specs=in_specs,
        out_specs=out_specs,
        out_shape=out_shape,
        compiler_params=pltpu.CompilerParams(
            dimension_semantics=("parallel", "parallel"),
            vmem_limit_bytes=vmem_limit,
        ),
    )(Q, K,
      wq, params["bq"], wkv, bkv, wo, params["bo"],
      params["g0"], params["b0"], params["g1"], params["b1"])

    O = outs[0]
    if return_attn:
        # (H, B, Nq, Nk) -> torch layout (H*B, Nq, Nk), free row-major reshape.
        A = outs[1].reshape(num_heads * B, Nq, Nk)
        return O, A
    return O, None


def mab_reference(params, Q, K, *, num_heads):
    """Pure-JAX (f32) reference replicating the torch forward, for checking."""
    dim_V = params["wq"].shape[1]
    q = Q @ params["wq"] + params["bq"]
    k = K @ params["wk"] + params["bk"]
    v = K @ params["wv"] + params["bv"]
    Q_ = jnp.concatenate(jnp.split(q, num_heads, axis=2), axis=0)
    K_ = jnp.concatenate(jnp.split(k, num_heads, axis=2), axis=0)
    V_ = jnp.concatenate(jnp.split(v, num_heads, axis=2), axis=0)
    s = jnp.einsum("bqd,bkd->bqk", Q_, K_) / math.sqrt(dim_V)
    A = jax.nn.softmax(s, axis=2)
    O = Q_ + jnp.einsum("bqk,bkd->bqd", A, V_)
    O = jnp.concatenate(jnp.split(O, num_heads, axis=0), axis=2)
    O = _layernorm(O, params["g0"], params["b0"])
    O = O + jax.nn.gelu(O @ params["wo"] + params["bo"], approximate=False)
    O = _layernorm(O, params["g1"], params["b1"])
    return O, A


if __name__ == "__main__":
    # Small shapes consistent with MAB(dim_Q, dim_K, dim_V, num_heads).
    B, Nq, Nk = 2, 8, 8
    dim_Q, dim_K, dim_V, num_heads = 32, 32, 32, 4

    key = jax.random.PRNGKey(0)
    ks = jax.random.split(key, 12)

    # Deterministic synthetic parameters (weights stored as (in, out), i.e. W.T).
    params = {
        "wq": 0.1 * jax.random.normal(ks[0], (dim_Q, dim_V), jnp.float32),
        "bq": 0.1 * jax.random.normal(ks[1], (1, dim_V), jnp.float32),
        "wk": 0.1 * jax.random.normal(ks[2], (dim_K, dim_V), jnp.float32),
        "bk": 0.1 * jax.random.normal(ks[3], (1, dim_V), jnp.float32),
        "wv": 0.1 * jax.random.normal(ks[4], (dim_K, dim_V), jnp.float32),
        "bv": 0.1 * jax.random.normal(ks[5], (1, dim_V), jnp.float32),
        "wo": 0.1 * jax.random.normal(ks[6], (dim_V, dim_V), jnp.float32),
        "bo": 0.1 * jax.random.normal(ks[7], (1, dim_V), jnp.float32),
        "g0": jnp.ones((1, dim_V), jnp.float32),
        "b0": jnp.zeros((1, dim_V), jnp.float32),
        "g1": jnp.ones((1, dim_V), jnp.float32),
        "b1": jnp.zeros((1, dim_V), jnp.float32),
    }

    Qx = jax.random.normal(ks[8], (B, Nq, dim_Q), jnp.float32)
    Kx = jax.random.normal(ks[9], (B, Nk, dim_K), jnp.float32)

    # TODO(synk): optional boolean `mask` argument not implemented (test uses mask=None).
    O, A = mab_forward(params, Qx, Kx, num_heads=num_heads)
    jax.block_until_ready((O, A))

    O_ref, A_ref = mab_reference(params, Qx, Kx, num_heads=num_heads)
    assert O.shape == (B, Nq, dim_V) and A.shape == (num_heads * B, Nq, Nk)
    # bf16 matmul inputs (f32 accumulation) + approx reciprocal -> tolerances
    # are looser than a pure-f32 path (acknowledged in review).
    assert jnp.max(jnp.abs(O - O_ref)) < 5e-2, "output mismatch vs reference"
    assert jnp.max(jnp.abs(A - A_ref)) < 1e-2, "attention mismatch vs reference"

    # Fast path (review item #1): skip the attention-matrix writeback entirely.
    O2, A2 = mab_forward(params, Qx, Kx, num_heads=num_heads, return_attn=False)
    jax.block_until_ready(O2)
    assert A2 is None
    assert jnp.max(jnp.abs(O2 - O_ref)) < 5e-2, "output mismatch (no-attn path)"

    print("KERNEL_OK")
</pallas_src>

<mosaic_0001>
module attributes {stable_mosaic.version = 11 : i64} {
  func.func @kernel(%arg0: i32, %arg1: i32, %arg2: memref<2x8x32xf32, #tpu.memory_space<vmem>>, %arg3: memref<2x8x32xf32, #tpu.memory_space<vmem>>, %arg4: memref<32x32xbf16, #tpu.memory_space<vmem>>, %arg5: memref<1x32xf32, #tpu.memory_space<vmem>>, %arg6: memref<32x64xbf16, #tpu.memory_space<vmem>>, %arg7: memref<1x64xf32, #tpu.memory_space<vmem>>, %arg8: memref<32x32xbf16, #tpu.memory_space<vmem>>, %arg9: memref<1x32xf32, #tpu.memory_space<vmem>>, %arg10: memref<1x32xf32, #tpu.memory_space<vmem>>, %arg11: memref<1x32xf32, #tpu.memory_space<vmem>>, %arg12: memref<1x32xf32, #tpu.memory_space<vmem>>, %arg13: memref<1x32xf32, #tpu.memory_space<vmem>>, %arg14: memref<2x8x32xf32, #tpu.memory_space<vmem>>, %arg15: memref<4x2x8x8xf32, #tpu.memory_space<vmem>>) attributes {dimension_semantics = [#tpu.dimension_semantics<parallel>, #tpu.dimension_semantics<parallel>], iteration_bounds = array<i64: 1, 1>, scalar_prefetch = 0 : i64, scratch_operands = 0 : i64, tpu.core_type = #tpu.core_type<tc>, window_params = [{transform_indices = @transform_0, window_bounds = array<i64: 2, 8, 32>}, {transform_indices = @transform_1, window_bounds = array<i64: 2, 8, 32>}, {pipeline_mode = #tpu.pipeline_mode<synchronous>, transform_indices = @transform_2, window_bounds = array<i64: 32, 32>}, {pipeline_mode = #tpu.pipeline_mode<synchronous>, transform_indices = @transform_3, window_bounds = array<i64: 1, 32>}, {pipeline_mode = #tpu.pipeline_mode<synchronous>, transform_indices = @transform_4, window_bounds = array<i64: 32, 64>}, {pipeline_mode = #tpu.pipeline_mode<synchronous>, transform_indices = @transform_5, window_bounds = array<i64: 1, 64>}, {pipeline_mode = #tpu.pipeline_mode<synchronous>, transform_indices = @transform_6, window_bounds = array<i64: 32, 32>}, {pipeline_mode = #tpu.pipeline_mode<synchronous>, transform_indices = @transform_7, window_bounds = array<i64: 1, 32>}, {pipeline_mode = #tpu.pipeline_mode<synchronous>, transform_indices = @transform_8, window_bounds = array<i64: 1, 32>}, {pipeline_mode = #tpu.pipeline_mode<synchronous>, transform_indices = @transform_9, window_bounds = array<i64: 1, 32>}, {pipeline_mode = #tpu.pipeline_mode<synchronous>, transform_indices = @transform_10, window_bounds = array<i64: 1, 32>}, {pipeline_mode = #tpu.pipeline_mode<synchronous>, transform_indices = @transform_11, window_bounds = array<i64: 1, 32>}, {transform_indices = @transform_12, window_bounds = array<i64: 2, 8, 32>}, {transform_indices = @transform_13, window_bounds = array<i64: 4, 2, 8, 8>}]} {
    %c0 = arith.constant 0 : index
    %c0_0 = arith.constant 0 : index
    %c0_1 = arith.constant 0 : index
    %0 = vector.load %arg2[%c0, %c0_0, %c0_1] : memref<2x8x32xf32, #tpu.memory_space<vmem>>, vector<2x8x32xf32>
    %1 = vector.shape_cast %0 : vector<2x8x32xf32> to vector<16x32xf32>
    %2 = arith.truncf %1 : vector<16x32xf32> to vector<16x32xbf16>
    %c0_2 = arith.constant 0 : index
    %c0_3 = arith.constant 0 : index
    %c0_4 = arith.constant 0 : index
    %3 = vector.load %arg3[%c0_2, %c0_3, %c0_4] : memref<2x8x32xf32, #tpu.memory_space<vmem>>, vector<2x8x32xf32>
    %4 = vector.shape_cast %3 : vector<2x8x32xf32> to vector<16x32xf32>
    %5 = arith.truncf %4 : vector<16x32xf32> to vector<16x32xbf16>
    %c0_5 = arith.constant 0 : index
    %c0_6 = arith.constant 0 : index
    %6 = vector.load %arg4[%c0_5, %c0_6] : memref<32x32xbf16, #tpu.memory_space<vmem>>, vector<32x32xbf16>
    %cst = arith.constant dense<0.000000e+00> : vector<16x32xf32>
    %7 = tpu.matmul %2, %6, %cst {dimension_numbers = #tpu.dot_dimension_numbers<[1], [0], [0], [1], [0, 0, 1, 1], [], []>} : vector<16x32xbf16>, vector<32x32xbf16>, vector<16x32xf32> -> vector<16x32xf32>
    %c0_7 = arith.constant 0 : index
    %c0_8 = arith.constant 0 : index
    %8 = vector.load %arg5[%c0_7, %c0_8] : memref<1x32xf32, #tpu.memory_space<vmem>>, vector<1x32xf32>
    %9 = vector.broadcast %8 : vector<1x32xf32> to vector<16x32xf32>
    %10 = arith.addf %7, %9 : vector<16x32xf32>
    %c0_9 = arith.constant 0 : index
    %c0_10 = arith.constant 0 : index
    %11 = vector.load %arg6[%c0_9, %c0_10] : memref<32x64xbf16, #tpu.memory_space<vmem>>, vector<32x64xbf16>
    %cst_11 = arith.constant dense<0.000000e+00> : vector<16x64xf32>
    %12 = tpu.matmul %5, %11, %cst_11 {dimension_numbers = #tpu.dot_dimension_numbers<[1], [0], [0], [1], [0, 0, 1, 1], [], []>} : vector<16x32xbf16>, vector<32x64xbf16>, vector<16x64xf32> -> vector<16x64xf32>
    %c0_12 = arith.constant 0 : index
    %c0_13 = arith.constant 0 : index
    %13 = vector.load %arg7[%c0_12, %c0_13] : memref<1x64xf32, #tpu.memory_space<vmem>>, vector<1x64xf32>
    %14 = vector.broadcast %13 : vector<1x64xf32> to vector<16x64xf32>
    %15 = arith.addf %12, %14 : vector<16x64xf32>
    %16 = arith.truncf %10 : vector<16x32xf32> to vector<16x32xbf16>
    %17 = arith.truncf %15 : vector<16x64xf32> to vector<16x64xbf16>
    %18 = vector.extract_strided_slice %16 {offsets = [0, 0], sizes = [16, 8], strides = [1, 1]} : vector<16x32xbf16> to vector<16x8xbf16>
    %19 = vector.extract_strided_slice %16 {offsets = [0, 8], sizes = [16, 8], strides = [1, 1]} : vector<16x32xbf16> to vector<16x8xbf16>
    %20 = vector.extract_strided_slice %16 {offsets = [0, 16], sizes = [16, 8], strides = [1, 1]} : vector<16x32xbf16> to vector<16x8xbf16>
    %21 = vector.extract_strided_slice %16 {offsets = [0, 24], sizes = [16, 8], strides = [1, 1]} : vector<16x32xbf16> to vector<16x8xbf16>
    %22 = vector.shape_cast %18 : vector<16x8xbf16> to vector<1x16x8xbf16>
    %23 = vector.shape_cast %19 : vector<16x8xbf16> to vector<1x16x8xbf16>
    %24 = vector.shape_cast %20 : vector<16x8xbf16> to vector<1x16x8xbf16>
    %25 = vector.shape_cast %21 : vector<16x8xbf16> to vector<1x16x8xbf16>
    %26 = tpu.concatenate %22, %23, %24, %25 in 0 : vector<1x16x8xbf16>, vector<1x16x8xbf16>, vector<1x16x8xbf16>, vector<1x16x8xbf16> -> vector<4x16x8xbf16>
    %27 = vector.shape_cast %26 : vector<4x16x8xbf16> to vector<8x8x8xbf16>
    %28 = vector.extract_strided_slice %17 {offsets = [0, 0], sizes = [16, 8], strides = [1, 1]} : vector<16x64xbf16> to vector<16x8xbf16>
    %29 = vector.extract_strided_slice %17 {offsets = [0, 8], sizes = [16, 8], strides = [1, 1]} : vector<16x64xbf16> to vector<16x8xbf16>
    %30 = vector.extract_strided_slice %17 {offsets = [0, 16], sizes = [16, 8], strides = [1, 1]} : vector<16x64xbf16> to vector<16x8xbf16>
    %31 = vector.extract_strided_slice %17 {offsets = [0, 24], sizes = [16, 8], strides = [1, 1]} : vector<16x64xbf16> to vector<16x8xbf16>
    %32 = vector.shape_cast %28 : vector<16x8xbf16> to vector<1x16x8xbf16>
    %33 = vector.shape_cast %29 : vector<16x8xbf16> to vector<1x16x8xbf16>
    %34 = vector.shape_cast %30 : vector<16x8xbf16> to vector<1x16x8xbf16>
    %35 = vector.shape_cast %31 : vector<16x8xbf16> to vector<1x16x8xbf16>
    %36 = tpu.concatenate %32, %33, %34, %35 in 0 : vector<1x16x8xbf16>, vector<1x16x8xbf16>, vector<1x16x8xbf16>, vector<1x16x8xbf16> -> vector<4x16x8xbf16>
    %37 = vector.shape_cast %36 : vector<4x16x8xbf16> to vector<8x8x8xbf16>
    %38 = vector.extract_strided_slice %17 {offsets = [0, 32], sizes = [16, 8], strides = [1, 1]} : vector<16x64xbf16> to vector<16x8xbf16>
    %39 = vector.extract_strided_slice %17 {offsets = [0, 40], sizes = [16, 8], strides = [1, 1]} : vector<16x64xbf16> to vector<16x8xbf16>
    %40 = vector.extract_strided_slice %17 {offsets = [0, 48], sizes = [16, 8], strides = [1, 1]} : vector<16x64xbf16> to vector<16x8xbf16>
    %41 = vector.extract_strided_slice %17 {offsets = [0, 56], sizes = [16, 8], strides = [1, 1]} : vector<16x64xbf16> to vector<16x8xbf16>
    %42 = vector.shape_cast %38 : vector<16x8xbf16> to vector<1x16x8xbf16>
    %43 = vector.shape_cast %39 : vector<16x8xbf16> to vector<1x16x8xbf16>
    %44 = vector.shape_cast %40 : vector<16x8xbf16> to vector<1x16x8xbf16>
    %45 = vector.shape_cast %41 : vector<16x8xbf16> to vector<1x16x8xbf16>
    %46 = tpu.concatenate %42, %43, %44, %45 in 0 : vector<1x16x8xbf16>, vector<1x16x8xbf16>, vector<1x16x8xbf16>, vector<1x16x8xbf16> -> vector<4x16x8xbf16>
    %47 = vector.shape_cast %46 : vector<4x16x8xbf16> to vector<8x8x8xbf16>
    "tpu.trace_start"() <{level = 10 : i32, message = "bqd,bkd->bqk"}> : () -> ()
    %cst_14 = arith.constant dense<0.000000e+00> : vector<8x8x8xf32>
    %48 = tpu.matmul %27, %37, %cst_14 {dimension_numbers = #tpu.dot_dimension_numbers<[2], [2], [1], [1], [0, 0, 0, 1, 1, 1], [0], [0]>} : vector<8x8x8xbf16>, vector<8x8x8xbf16>, vector<8x8x8xf32> -> vector<8x8x8xf32>
    "tpu.trace_stop"() : () -> ()
    %cst_15 = arith.constant dense<0xFF800000> : vector<8x8xf32>
    %49 = vector.multi_reduction <maximumf>, %48, %cst_15 [2] : vector<8x8x8xf32> to vector<8x8xf32>
    %50 = vector.shape_cast %49 : vector<8x8xf32> to vector<8x8x1xf32>
    %51 = vector.broadcast %50 : vector<8x8x1xf32> to vector<8x8x8xf32>
    %52 = arith.subf %48, %51 : vector<8x8x8xf32>
    %53 = math.exp %52 : vector<8x8x8xf32>
    %cst_16 = arith.constant dense<0.000000e+00> : vector<8x8xf32>
    %54 = vector.multi_reduction <add>, %53, %cst_16 [2] : vector<8x8x8xf32> to vector<8x8xf32>
    %55 = vector.shape_cast %54 : vector<8x8xf32> to vector<8x8x1xf32>
    %56 = tpu.reciprocal %55 {approx = true} : vector<8x8x1xf32> -> vector<8x8x1xf32>
    %57 = vector.broadcast %56 : vector<8x8x1xf32> to vector<8x8x8xf32>
    %58 = arith.mulf %53, %57 : vector<8x8x8xf32>
    %59 = vector.shape_cast %58 : vector<8x8x8xf32> to vector<4x2x8x8xf32>
    %c0_17 = arith.constant 0 : index
    %c0_18 = arith.constant 0 : index
    %c0_19 = arith.constant 0 : index
    %c0_20 = arith.constant 0 : index
    %60 = vector.load %arg15[%c0_17, %c0_18, %c0_19, %c0_20] : memref<4x2x8x8xf32, #tpu.memory_space<vmem>>, vector<4x2x8x8xf32>
    tpu.vector_store %arg15[%c0_17, %c0_18, %c0_19, %c0_20], %59 {strides = array<i32>} : memref<4x2x8x8xf32, #tpu.memory_space<vmem>>, vector<4x2x8x8xf32>,
    %61 = arith.truncf %58 : vector<8x8x8xf32> to vector<8x8x8xbf16>
    "tpu.trace_start"() <{level = 10 : i32, message = "bqk,bkd->bqd"}> : () -> ()
    %cst_21 = arith.constant dense<0.000000e+00> : vector<8x8x8xf32>
    %62 = tpu.matmul %61, %47, %cst_21 {dimension_numbers = #tpu.dot_dimension_numbers<[2], [1], [1], [2], [0, 0, 0, 1, 1, 2], [0], [0]>} : vector<8x8x8xbf16>, vector<8x8x8xbf16>, vector<8x8x8xf32> -> vector<8x8x8xf32>
    "tpu.trace_stop"() : () -> ()
    %63 = vector.shape_cast %62 : vector<8x8x8xf32> to vector<4x16x8xf32>
    %64 = vector.extract_strided_slice %63 {offsets = [0, 0, 0], sizes = [1, 16, 8], strides = [1, 1, 1]} : vector<4x16x8xf32> to vector<1x16x8xf32>
    %65 = vector.shape_cast %64 : vector<1x16x8xf32> to vector<16x8xf32>
    %66 = vector.extract_strided_slice %63 {offsets = [1, 0, 0], sizes = [1, 16, 8], strides = [1, 1, 1]} : vector<4x16x8xf32> to vector<1x16x8xf32>
    %67 = vector.shape_cast %66 : vector<1x16x8xf32> to vector<16x8xf32>
    %68 = vector.extract_strided_slice %63 {offsets = [2, 0, 0], sizes = [1, 16, 8], strides = [1, 1, 1]} : vector<4x16x8xf32> to vector<1x16x8xf32>
    %69 = vector.shape_cast %68 : vector<1x16x8xf32> to vector<16x8xf32>
    %70 = vector.extract_strided_slice %63 {offsets = [3, 0, 0], sizes = [1, 16, 8], strides = [1, 1, 1]} : vector<4x16x8xf32> to vector<1x16x8xf32>
    %71 = vector.shape_cast %70 : vector<1x16x8xf32> to vector<16x8xf32>
    %72 = tpu.concatenate %65, %67, %69, %71 in 1 : vector<16x8xf32>, vector<16x8xf32>, vector<16x8xf32>, vector<16x8xf32> -> vector<16x32xf32>
    %73 = arith.addf %10, %72 : vector<16x32xf32>
    %c0_22 = arith.constant 0 : index
    %c0_23 = arith.constant 0 : index
    %74 = vector.load %arg10[%c0_22, %c0_23] : memref<1x32xf32, #tpu.memory_space<vmem>>, vector<1x32xf32>
    %c0_24 = arith.constant 0 : index
    %c0_25 = arith.constant 0 : index
    %75 = vector.load %arg11[%c0_24, %c0_25] : memref<1x32xf32, #tpu.memory_space<vmem>>, vector<1x32xf32>
    %cst_26 = arith.constant dense<0.000000e+00> : vector<16xf32>
    %76 = vector.multi_reduction <add>, %73, %cst_26 [1] : vector<16x32xf32> to vector<16xf32>
    %77 = vector.shape_cast %76 : vector<16xf32> to vector<16x1xf32>
    %cst_27 = arith.constant 3.200000e+01 : f32
    %78 = vector.broadcast %cst_27 : f32 to vector<16x1xf32>
    %79 = arith.divf %77, %78 : vector<16x1xf32>
    %80 = vector.broadcast %79 : vector<16x1xf32> to vector<16x32xf32>
    %81 = arith.subf %73, %80 : vector<16x32xf32>
    %82 = arith.mulf %81, %81 : vector<16x32xf32>
    %cst_28 = arith.constant dense<0.000000e+00> : vector<16xf32>
    %83 = vector.multi_reduction <add>, %82, %cst_28 [1] : vector<16x32xf32> to vector<16xf32>
    %84 = vector.shape_cast %83 : vector<16xf32> to vector<16x1xf32>
    %cst_29 = arith.constant 3.200000e+01 : f32
    %85 = vector.broadcast %cst_29 : f32 to vector<16x1xf32>
    %86 = arith.divf %84, %85 : vector<16x1xf32>
    %87 = vector.broadcast %79 : vector<16x1xf32> to vector<16x32xf32>
    %88 = arith.subf %73, %87 : vector<16x32xf32>
    %cst_30 = arith.constant 9.99999974E-6 : f32
    %89 = vector.broadcast %cst_30 : f32 to vector<16x1xf32>
    %90 = arith.addf %86, %89 : vector<16x1xf32>
    %91 = math.rsqrt %90 : vector<16x1xf32>
    %92 = vector.broadcast %91 : vector<16x1xf32> to vector<16x32xf32>
    %93 = arith.mulf %88, %92 : vector<16x32xf32>
    %94 = vector.broadcast %74 : vector<1x32xf32> to vector<16x32xf32>
    %95 = arith.mulf %93, %94 : vector<16x32xf32>
    %96 = vector.broadcast %75 : vector<1x32xf32> to vector<16x32xf32>
    %97 = arith.addf %95, %96 : vector<16x32xf32>
    %98 = arith.truncf %97 : vector<16x32xf32> to vector<16x32xbf16>
    %c0_31 = arith.constant 0 : index
    %c0_32 = arith.constant 0 : index
    %99 = vector.load %arg8[%c0_31, %c0_32] : memref<32x32xbf16, #tpu.memory_space<vmem>>, vector<32x32xbf16>
    %cst_33 = arith.constant dense<0.000000e+00> : vector<16x32xf32>
    %100 = tpu.matmul %98, %99, %cst_33 {dimension_numbers = #tpu.dot_dimension_numbers<[1], [0], [0], [1], [0, 0, 1, 1], [], []>} : vector<16x32xbf16>, vector<32x32xbf16>, vector<16x32xf32> -> vector<16x32xf32>
    %c0_34 = arith.constant 0 : index
    %c0_35 = arith.constant 0 : index
    %101 = vector.load %arg9[%c0_34, %c0_35] : memref<1x32xf32, #tpu.memory_space<vmem>>, vector<1x32xf32>
    %102 = vector.broadcast %101 : vector<1x32xf32> to vector<16x32xf32>
    %103 = arith.addf %100, %102 : vector<16x32xf32>
    %cst_36 = arith.constant 5.000000e-01 : f32
    %104 = vector.broadcast %cst_36 : f32 to vector<16x32xf32>
    %105 = arith.mulf %104, %103 : vector<16x32xf32>
    %cst_37 = arith.constant 0.707106769 : f32
    %106 = vector.broadcast %cst_37 : f32 to vector<16x32xf32>
    %107 = arith.mulf %103, %106 : vector<16x32xf32>
    %108 = math.erf %107 : vector<16x32xf32>
    %cst_38 = arith.constant 1.000000e+00 : f32
    %109 = vector.broadcast %cst_38 : f32 to vector<16x32xf32>
    %110 = arith.addf %109, %108 : vector<16x32xf32>
    %111 = arith.mulf %105, %110 : vector<16x32xf32>
    %112 = arith.addf %97, %111 : vector<16x32xf32>
    %c0_39 = arith.constant 0 : index
    %c0_40 = arith.constant 0 : index
    %113 = vector.load %arg12[%c0_39, %c0_40] : memref<1x32xf32, #tpu.memory_space<vmem>>, vector<1x32xf32>
    %c0_41 = arith.constant 0 : index
    %c0_42 = arith.constant 0 : index
    %114 = vector.load %arg13[%c0_41, %c0_42] : memref<1x32xf32, #tpu.memory_space<vmem>>, vector<1x32xf32>
    %cst_43 = arith.constant dense<0.000000e+00> : vector<16xf32>
    %115 = vector.multi_reduction <add>, %112, %cst_43 [1] : vector<16x32xf32> to vector<16xf32>
    %116 = vector.shape_cast %115 : vector<16xf32> to vector<16x1xf32>
    %cst_44 = arith.constant 3.200000e+01 : f32
    %117 = vector.broadcast %cst_44 : f32 to vector<16x1xf32>
    %118 = arith.divf %116, %117 : vector<16x1xf32>
    %119 = vector.broadcast %118 : vector<16x1xf32> to vector<16x32xf32>
    %120 = arith.subf %112, %119 : vector<16x32xf32>
    %121 = arith.mulf %120, %120 : vector<16x32xf32>
    %cst_45 = arith.constant dense<0.000000e+00> : vector<16xf32>
    %122 = vector.multi_reduction <add>, %121, %cst_45 [1] : vector<16x32xf32> to vector<16xf32>
    %123 = vector.shape_cast %122 : vector<16xf32> to vector<16x1xf32>
    %cst_46 = arith.constant 3.200000e+01 : f32
    %124 = vector.broadcast %cst_46 : f32 to vector<16x1xf32>
    %125 = arith.divf %123, %124 : vector<16x1xf32>
    %126 = vector.broadcast %118 : vector<16x1xf32> to vector<16x32xf32>
    %127 = arith.subf %112, %126 : vector<16x32xf32>
    %cst_47 = arith.constant 9.99999974E-6 : f32
    %128 = vector.broadcast %cst_47 : f32 to vector<16x1xf32>
    %129 = arith.addf %125, %128 : vector<16x1xf32>
    %130 = math.rsqrt %129 : vector<16x1xf32>
    %131 = vector.broadcast %130 : vector<16x1xf32> to vector<16x32xf32>
    %132 = arith.mulf %127, %131 : vector<16x32xf32>
    %133 = vector.broadcast %113 : vector<1x32xf32> to vector<16x32xf32>
    %134 = arith.mulf %132, %133 : vector<16x32xf32>
    %135 = vector.broadcast %114 : vector<1x32xf32> to vector<16x32xf32>
    %136 = arith.addf %134, %135 : vector<16x32xf32>
    %137 = vector.shape_cast %136 : vector<16x32xf32> to vector<2x8x32xf32>
    %c0_48 = arith.constant 0 : index
    %c0_49 = arith.constant 0 : index
    %c0_50 = arith.constant 0 : index
    %138 = vector.load %arg14[%c0_48, %c0_49, %c0_50] : memref<2x8x32xf32, #tpu.memory_space<vmem>>, vector<2x8x32xf32>
    tpu.vector_store %arg14[%c0_48, %c0_49, %c0_50], %137 {strides = array<i32>} : memref<2x8x32xf32, #tpu.memory_space<vmem>>, vector<2x8x32xf32>,
    return
  }
  func.func @transform_0(%arg0: i32, %arg1: i32) -> (i32, i32, i32) {
    %c0_i32 = arith.constant 0 : i32
    %c0_i32_0 = arith.constant 0 : i32
    return %arg0, %arg1, %c0_i32 : i32, i32, i32
  }
  func.func @transform_1(%arg0: i32, %arg1: i32) -> (i32, i32, i32) {
    %c0_i32 = arith.constant 0 : i32
    %c0_i32_0 = arith.constant 0 : i32
    %c0_i32_1 = arith.constant 0 : i32
    return %arg0, %c0_i32, %c0_i32_0 : i32, i32, i32
  }
  func.func @transform_2(%arg0: i32, %arg1: i32) -> (i32, i32) {
    %c0_i32 = arith.constant 0 : i32
    %c0_i32_0 = arith.constant 0 : i32
    %c0_i32_1 = arith.constant 0 : i32
    return %c0_i32, %c0_i32_0 : i32, i32
  }
  func.func @transform_3(%arg0: i32, %arg1: i32) -> (i32, i32) {
    %c0_i32 = arith.constant 0 : i32
    %c0_i32_0 = arith.constant 0 : i32
    %c0_i32_1 = arith.constant 0 : i32
    return %c0_i32, %c0_i32_0 : i32, i32
  }
  func.func @transform_4(%arg0: i32, %arg1: i32) -> (i32, i32) {
    %c0_i32 = arith.constant 0 : i32
    %c0_i32_0 = arith.constant 0 : i32
    %c0_i32_1 = arith.constant 0 : i32
    return %c0_i32, %c0_i32_0 : i32, i32
  }
  func.func @transform_5(%arg0: i32, %arg1: i32) -> (i32, i32) {
    %c0_i32 = arith.constant 0 : i32
    %c0_i32_0 = arith.constant 0 : i32
    %c0_i32_1 = arith.constant 0 : i32
    return %c0_i32, %c0_i32_0 : i32, i32
  }
  func.func @transform_6(%arg0: i32, %arg1: i32) -> (i32, i32) {
    %c0_i32 = arith.constant 0 : i32
    %c0_i32_0 = arith.constant 0 : i32
    %c0_i32_1 = arith.constant 0 : i32
    return %c0_i32, %c0_i32_0 : i32, i32
  }
  func.func @transform_7(%arg0: i32, %arg1: i32) -> (i32, i32) {
    %c0_i32 = arith.constant 0 : i32
    %c0_i32_0 = arith.constant 0 : i32
    %c0_i32_1 = arith.constant 0 : i32
    return %c0_i32, %c0_i32_0 : i32, i32
  }
  func.func @transform_8(%arg0: i32, %arg1: i32) -> (i32, i32) {
    %c0_i32 = arith.constant 0 : i32
    %c0_i32_0 = arith.constant 0 : i32
    %c0_i32_1 = arith.constant 0 : i32
    return %c0_i32, %c0_i32_0 : i32, i32
  }
  func.func @transform_9(%arg0: i32, %arg1: i32) -> (i32, i32) {
    %c0_i32 = arith.constant 0 : i32
    %c0_i32_0 = arith.constant 0 : i32
    %c0_i32_1 = arith.constant 0 : i32
    return %c0_i32, %c0_i32_0 : i32, i32
  }
  func.func @transform_10(%arg0: i32, %arg1: i32) -> (i32, i32) {
    %c0_i32 = arith.constant 0 : i32
    %c0_i32_0 = arith.constant 0 : i32
    %c0_i32_1 = arith.constant 0 : i32
    return %c0_i32, %c0_i32_0 : i32, i32
  }
  func.func @transform_11(%arg0: i32, %arg1: i32) -> (i32, i32) {
    %c0_i32 = arith.constant 0 : i32
    %c0_i32_0 = arith.constant 0 : i32
    %c0_i32_1 = arith.constant 0 : i32
    return %c0_i32, %c0_i32_0 : i32, i32
  }
  func.func @transform_12(%arg0: i32, %arg1: i32) -> (i32, i32, i32) {
    %c0_i32 = arith.constant 0 : i32
    %c0_i32_0 = arith.constant 0 : i32
    return %arg0, %arg1, %c0_i32 : i32, i32, i32
  }
  func.func @transform_13(%arg0: i32, %arg1: i32) -> (i32, i32, i32, i32) {
    %c0_i32 = arith.constant 0 : i32
    %c0_i32_0 = arith.constant 0 : i32
    %c0_i32_1 = arith.constant 0 : i32
    return %c0_i32, %arg0, %arg1, %c0_i32_0 : i32, i32, i32, i32
  }
}

</mosaic_0001>

<bundles_post_ra>
// kernel: mab_forward.1
= control target key start
LH: loop header
LB: loop body
LE: loop exit
PB: predicated region body
PF: predicated region fallthrough
CT: control target
= control target key end

     0   :  { %19 = vsyncpa [#allocation3], 0  ;;  %v1653_v1 = vmov 0.0   ;;  %vm1654_vm0 = vmmov 0   ;;  %vm75_vm1 = vcmask 261120   ;;  %s2033_s0 = inlined_call_operand.vmem [shape: f32[2,8,32], index: 0, kind: input, shape index: {}]   ;;  %s2034_s1 = inlined_call_operand.vmem [shape: f32[2,8,32], index: 1, kind: input, shape index: {}]   ;;  %s2035_s2 = inlined_call_operand.vmem [shape: bf16[32,32], index: 2, kind: input, shape index: {}]   ;;  %s2036_s3 = inlined_call_operand.vmem [shape: f32[1,32], index: 3, kind: input, shape index: {}]   ;;  %s2037_s4 = inlined_call_operand.vmem [shape: bf16[32,64], index: 4, kind: input, shape index: {}]   ;;  %s2038_s5 = inlined_call_operand.vmem [shape: f32[1,64], index: 5, kind: input, shape index: {}]   ;;  %s2039_s6 = inlined_call_operand.vmem [shape: bf16[32,32], index: 6, kind: input, shape index: {}]   ;;  %s2040_s7 = inlined_call_operand.vmem [shape: f32[1,32], index: 7, kind: input, shape index: {}]   ;;  %s2041_s8 = inlined_call_operand.vmem [shape: f32[1,32], index: 8, kind: input, shape index: {}]   ;;  %s2042_s9 = inlined_call_operand.vmem [shape: f32[1,32], index: 9, kind: input, shape index: {}]   ;;  %s2043_s10 = inlined_call_operand.vmem [shape: f32[1,32], index: 10, kind: input, shape index: {}]   ;;  %s2044_s11 = inlined_call_operand.vmem [shape: f32[1,32], index: 11, kind: input, shape index: {}]   ;;  %s2045_s12 = inlined_call_operand.hbm [shape: f32[2,8,32], index: 12, kind: output, shape index: {0}]   ;;  %s2046_s13 = inlined_call_operand.hbm [shape: f32[4,2,8,8], index: 13, kind: output, shape index: {1}]  }
   0x1   :  { %v1555_v0 = vld [vmem:[%s2037_s4] sm:$0xff]   ;;  %1431 = vmatprep.subr.bf16.mxu1 %v1653_v1  ;;  %1423 = vmatprep.subr.bf16.mxu0 %v1653_v1  ;;  %v1557_v3 = vld [vmem:[%s2037_s4 + $0x8] sm:$0xff]  }
   0x2   :  { %v1556_v2 = vld [vmem:[%s2035_s2] sm:$0xff]   ;;  %1432 = vmatpush3.bf16.msra.mxu1 %v1555_v0  ;;  %1435 = vmatprep.mubr.msk.bf16.mxu1 %vm1654_vm0, %v1653_v1  ;;  %v50_v5 = vld [vmem:[%s2034_s1 + $0x8] sm:$0xff] }
   0x3   :  { %1433 = vmatprep.subr.bf16.mxu1 %v1653_v1  ;;  %1424 = vmatpush3.bf16.msra.mxu0 %v1556_v2  ;;  %v49_v4 = vld [vmem:[%s2034_s1] sm:$0xff]  ;;  %v1558_v6 = vld [vmem:[%s2035_s2 + $0x8] sm:$0xff]  }
   0x4   :  { %1425 = vmatprep.subr.bf16.mxu0 %v1653_v1  ;;  %1427 = vmatprep.mubr.msk.bf16.mxu0 %vm1654_vm0, %v1653_v1  ;;  %v46_v7 = vld [vmem:[%s2033_s0] sm:$0xff]  ;;  %v51_v8 = vpack.c.bf16 %v50_v5, %v49_v4  ;;  %v47_v9 = vld [vmem:[%s2033_s0 + $0x8] sm:$0xff] }
   0x5   :  { %v48_v10 = vpack.c.bf16 %v47_v9, %v46_v7 }
   0x6   :  { %1434 = vmatpush3.bf16.msra.mxu1 %v1557_v3 }
   0x7   :  { %1426 = vmatpush3.bf16.msra.mxu0 %v1558_v6  ;;  %1445 = vmatprep.subr.bf16.mxu1 %v1653_v1 }
   0x8   :  { %20 = vsyncpa [#allocation5], 0  ;;  %1439 = vmatprep.subr.bf16.mxu0 %v1653_v1  ;;  %v1334_v11 = vld [vmem:[%s2038_s5] ss:$0 sm:$0xff]  ;;  %vm235_vm2 = vcmask 64512   ;;  %s1656_s5 = smov 120  }
   0x9   :  { %1436 = vmatmul.mubr.msk.bf16.vlgmr.msra.gmra.mrb[0].mxu1 %vm75_vm1, %v51_v8  ;;  %v1330_v13 = vld [vmem:[%s2036_s3] ss:$0 sm:$0xff]  ;;  %s1655_s3 = smov 112   ;;  %s1657_s24 = smov 104   ;;  %vm713_vm3 = vcmask 1043456   ;;  %vm1119_vm4 = vcmask 130048  }
   0xa   :  { %1428 = vmatmul.mubr.msk.bf16.vlgmr.msra.gmra.mrb[0].mxu0 %vm75_vm1, %v48_v10  ;;  %1447 = vmatprep.mubr.msk.bf16.mxu1 %vm1654_vm0, %v1653_v1  ;;  %s1658_s25 = smov 96   ;;  %s1659_s26 = smov 8   ;;  %vm1122_vm5 = vcmask 195584  }
   0xb   :  { %1441 = vmatprep.mubr.msk.bf16.mxu0 %vm1654_vm0, %v1653_v1  ;;  %s1660_s27 = smov 16   ;;  %s1661_s28 = smov 24  }
  0xdc   :  { %v180_v12 = vpop.f32.mrb[0].mxu1 }
  0xdd   :  { %v181_v14 = vadd.f32 %v1334_v11, %v180_v12  ;;  %v1437_v15 = vpop.f32.mrb[1].mxu1  ;;  %v113_v16 = vpop.f32.mrb[0].mxu0 }
  0xde   :  { %v183_v17 = vpop.f32.mrb[2].mxu1  ;;  %v1429_v18 = vpop.f32.mrb[1].mxu0  ;;  %v1781_v22 = vadd.f32 %v1330_v13, %v113_v16 }
  0xdf   :  { %v1380_v19 = vpack.c.bf16 %v181_v14, %v181_v14  ;;  %v184_v20 = vadd.f32 %v1334_v11, %v183_v17  ;;  %v1438_v21 = vpop.f32.mrb[3].mxu1  ;;  %v116_v23 = vpop.f32.mrb[2].mxu0 }
  0xe0   :  { %v1783_v24 = vadd.f32 %v1330_v13, %v116_v23  ;;  %v1430_v25 = vpop.f32.mrb[3].mxu0  ;;  %v1378_v31 = vpack.c.bf16 %v1781_v22, %v1781_v22 }
  0xe1   :  { %v188_v26 = vpack.c.bf16 %v184_v20, %v181_v14  ;;  %v1785_v27 = vpack.c.bf16 %v184_v20, %v184_v20  ;;  %v240_v28 = vsel %vm235_vm2, %v1380_v19, 0 }
  0xe2   :  { %1440 = vmatpush3.bf16.xpose.msra.mxu0 %v240_v28  ;;  %v187_v30 = vpack.c.bf16 %v1783_v24, %v1781_v22  ;;  %v1379_v32 = vpack.c.bf16 %v1783_v24, %v1783_v24 }
  0xe3   :  { %215 = vrot.lane.b32.xlu1 %v188_v26, %s1655_s3  ;;  %213 = vrot.lane.b32.xlu0 %v188_v26, %s1656_s5  ;;  %v286_v29 = vsel %vm235_vm2, %v1785_v27, 0 }
  0xe4   :  { %1446 = vmatpush3.bf16.xpose.msra.mxu1 %v286_v29  ;;  %1451 = vmatprep.subr.bf16.mxu0 %v1653_v1 }
  0xe5   :  { %1457 = vmatprep.subr.bf16.mxu1 %v1653_v1 }
  0xe7   :  { %192 = vrot.lane.b32.xlu1 %v187_v30, %s1655_s3  ;;  %190 = vrot.lane.b32.xlu0 %v187_v30, %s1656_s5 }
  0xe9   :  { %1442 = vmatmul.mubr.msk.bf16.vlgmr.msra.gmra.mrb[4].mxu0 %vm235_vm2, %v1378_v31 }
  0xea   :  { %1453 = vmatprep.mubr.msk.bf16.mxu0 %vm1654_vm0, %v1653_v1 }
  0xeb   :  { %1448 = vmatmul.mubr.msk.bf16.vlgmr.msra.gmra.mrb[4].mxu1 %vm235_vm2, %v1379_v32  ;;  %194 = vrot.lane.b32.xlu1 %v187_v30, %s1657_s24 }
  0xec   :  { %217 = vrot.lane.b32.xlu0 %v188_v26, %s1657_s24  ;;  %1459 = vmatprep.mubr.msk.bf16.mxu1 %vm1654_vm0, %v1653_v1 }
  0xef   :  { %708 = vrot.lane.b32.xlu1 %v1380_v19, %s1658_s25 }
 0x155   :  { %v214_v33 = vpop.permute.xlu0 %213  ;;  %v216_v38 = vpop.permute.xlu1 %215 }
 0x156   :  { %v1805_v34 = vcombine.low %v214_v33, %v214_v33  ;;  %v1807_v35 = vcombine.high %v214_v33, %v214_v33  ;;  %v1815_v40 = vcombine.low %v216_v38, %v216_v38  ;;  %v1817_v41 = vcombine.high %v216_v38, %v216_v38 }
 0x158   :  { %v332_v36 = vsel %vm235_vm2, %v1805_v34, 0  ;;  %v378_v37 = vsel %vm235_vm2, %v1807_v35, 0  ;;  %v424_v44 = vsel %vm235_vm2, %v1815_v40, 0  ;;  %v470_v45 = vsel %vm235_vm2, %v1817_v41, 0 }
 0x159   :  { %1452 = vmatpush3.bf16.xpose.msra.mxu0 %v332_v36  ;;  %1458 = vmatpush3.bf16.xpose.msra.mxu1 %v378_v37  ;;  %v191_v39 = vpop.permute.xlu0 %190  ;;  %v193_v46 = vpop.permute.xlu1 %192 }
 0x15a   :  { %1463 = vmatprep.subr.bf16.mxu0 %v1653_v1  ;;  %1469 = vmatprep.subr.bf16.mxu1 %v1653_v1  ;;  %v1340_v42 = vcombine.low %v191_v39, %v191_v39  ;;  %v1341_v43 = vcombine.high %v191_v39, %v191_v39  ;;  %v1342_v50 = vcombine.low %v193_v46, %v193_v46 }
 0x15b   :  { %v1343_v51 = vcombine.high %v193_v46, %v193_v46 }
 0x15d   :  { %v195_v52 = vpop.permute.xlu1 %194 }
 0x15e   :  { %v218_v47 = vpop.permute.xlu0 %217  ;;  %v1344_v56 = vcombine.low %v195_v52, %v195_v52  ;;  %v1345_v57 = vcombine.high %v195_v52, %v195_v52 }
 0x15f   :  { %v1831_v48 = vcombine.low %v218_v47, %v218_v47  ;;  %v1833_v49 = vcombine.high %v218_v47, %v218_v47 }
 0x160   :  { %1454 = vmatmul.mubr.msk.bf16.vlgmr.msra.gmra.mrb[8].mxu0 %vm235_vm2, %v1340_v42  ;;  %1460 = vmatmul.mubr.msk.bf16.vlgmr.msra.gmra.mrb[8].mxu1 %vm235_vm2, %v1341_v43 }
 0x161   :  { %1464 = vmatpush3.bf16.xpose.msra.mxu0 %v424_v44  ;;  %1470 = vmatpush3.bf16.xpose.msra.mxu1 %v470_v45  ;;  %v516_v53 = vsel %vm235_vm2, %v1831_v48, 0  ;;  %v562_v54 = vsel %vm235_vm2, %v1833_v49, 0  ;;  %v709_v55 = vpop.permute.xlu1 %708 }
 0x162   :  { %1465 = vmatprep.mubr.msk.bf16.mxu0 %vm1654_vm0, %v1653_v1  ;;  %1471 = vmatprep.mubr.msk.bf16.mxu1 %vm1654_vm0, %v1653_v1  ;;  %v715_v58 = vsel %vm713_vm3, %v709_v55, 0 }
 0x163   :  { %1475 = vmatprep.subr.bf16.mxu0 %v1653_v1  ;;  %1481 = vmatprep.subr.bf16.mxu1 %v1653_v1 }
 0x168   :  { %1466 = vmatmul.mubr.msk.bf16.vlgmr.msra.gmra.mrb[12].mxu0 %vm235_vm2, %v1342_v50  ;;  %1472 = vmatmul.mubr.msk.bf16.vlgmr.msra.gmra.mrb[12].mxu1 %vm235_vm2, %v1343_v51 }
 0x169   :  { %1476 = vmatpush3.bf16.xpose.msra.mxu0 %v516_v53  ;;  %1482 = vmatpush3.bf16.xpose.msra.mxu1 %v562_v54 }
 0x16a   :  { %1477 = vmatprep.mubr.msk.bf16.mxu0 %vm1654_vm0, %v1653_v1  ;;  %1483 = vmatprep.mubr.msk.bf16.mxu1 %vm1654_vm0, %v1653_v1 }
 0x16b   :  { %1487 = vmatprep.subr.bf16.mxu0 %v1653_v1  ;;  %1493 = vmatprep.subr.bf16.mxu1 %v1653_v1 }
 0x170   :  { %1478 = vmatmul.mubr.msk.bf16.vlgmr.msra.gmra.mrb[16].mxu0 %vm235_vm2, %v1344_v56  ;;  %1484 = vmatmul.mubr.msk.bf16.vlgmr.msra.gmra.mrb[16].mxu1 %vm235_vm2, %v1345_v57 }
 0x171   :  { %1488 = vmatpush3.bf16.msra.mxu0 %v715_v58  ;;  %1495 = vmatprep.mubr.msk.bf16.mxu1 %vm1654_vm0, %v1653_v1 }
 0x172   :  { %1489 = vmatprep.mubr.msk.bf16.mxu0 %vm1654_vm0, %v1653_v1  ;;  %1499 = vmatprep.subr.bf16.mxu0 %v1653_v1 }
 0x1bc   :  { %v276_v59 = vpop.f32.mrb[4].mxu0 }
 0x1bd   :  { %v1443_v60 = vpop.f32.mrb[5].mxu0  ;;  %v604_v61 = vsel %vm235_vm2, %v276_v59, -inf }
 0x1be   :  { %v322_v62 = vpop.f32.mrb[4].mxu1  ;;  %605 = vmax.xlane.f32.xlu0 %v604_v61  ;;  %v279_v63 = vpop.f32.mrb[6].mxu0 }
 0x1bf   :  { %v1444_v0 = vpop.f32.mrb[7].mxu0  ;;  %v1449_v2 = vpop.f32.mrb[5].mxu1  ;;  %v607_v3 = vsel %vm235_vm2, %v322_v62, -inf }
 0x1c0   :  { %v325_v4 = vpop.f32.mrb[6].mxu1  ;;  %608 = vmax.xlane.f32.xlu1 %v607_v3 }
 0x1c1   :  { %v1450_v5 = vpop.f32.mrb[7].mxu1 }
 0x233   :  { %v368_v6 = vpop.f32.mrb[8].mxu0  ;;  %v414_v7 = vpop.f32.mrb[8].mxu1 }
 0x234   :  { %v1455_v8 = vpop.f32.mrb[9].mxu0  ;;  %v1461_v9 = vpop.f32.mrb[9].mxu1  ;;  %v610_v10 = vsel %vm235_vm2, %v368_v6, -inf  ;;  %v613_v15 = vsel %vm235_vm2, %v414_v7, -inf }
 0x235   :  { %v417_v11 = vpop.f32.mrb[10].mxu1  ;;  %611 = vmax.xlane.f32.xlu0 %v610_v10  ;;  %v371_v12 = vpop.f32.mrb[10].mxu0 }
 0x236   :  { %v1456_v13 = vpop.f32.mrb[11].mxu0  ;;  %v1462_v14 = vpop.f32.mrb[11].mxu1 }
 0x239   :  { %614 = vmax.xlane.f32.xlu0 %v613_v15 }
 0x23b   :  { %v1859_v16 = vpop.f32.mrb[12].mxu0  ;;  %v1861_v17 = vpop.f32.mrb[12].mxu1 }
 0x23c   :  { %v1467_v18 = vpop.f32.mrb[13].mxu0  ;;  %v1473_v19 = vpop.f32.mrb[13].mxu1  ;;  %v619_v20 = vsel %vm235_vm2, %v1861_v17, -inf  ;;  %v616_v21 = vsel %vm235_vm2, %v1859_v16, -inf }
 0x23d   :  { %v509_v23 = vpop.f32.mrb[14].mxu1  ;;  %620 = vmax.xlane.f32.xlu0 %v619_v20  ;;  %617 = vmax.xlane.f32.xlu1 %v616_v21  ;;  %v463_v25 = vpop.f32.mrb[14].mxu0 }
 0x23e   :  { %v1468_v26 = vpop.f32.mrb[15].mxu0  ;;  %v1474_v28 = vpop.f32.mrb[15].mxu1 }
 0x243   :  { %v552_v29 = vpop.f32.mrb[16].mxu0  ;;  %v598_v30 = vpop.f32.mrb[16].mxu1 }
 0x244   :  { %v1479_v31 = vpop.f32.mrb[17].mxu0  ;;  %v1485_v32 = vpop.f32.mrb[17].mxu1  ;;  %v625_v33 = vsel %vm235_vm2, %v598_v30, -inf  ;;  %v622_v36 = vsel %vm235_vm2, %v552_v29, -inf }
 0x245   :  { %v601_v37 = vpop.f32.mrb[18].mxu1  ;;  %626 = vmax.xlane.f32.xlu0 %v625_v33  ;;  %623 = vmax.xlane.f32.xlu1 %v622_v36  ;;  %v555_v38 = vpop.f32.mrb[18].mxu0 }
 0x246   :  { %v1480_v39 = vpop.f32.mrb[19].mxu0  ;;  %v1486_v42 = vpop.f32.mrb[19].mxu1 }
 0x24b   :  { %v606_v45 = vpop.xlane.xlu0 %605 }
 0x24c   :  { %v628_v46 = vsub.f32 %v276_v59, %v606_v45 }
 0x24d   :  { %v609_v43 = vpop.xlane.xlu1 %608 }
 0x24e   :  { %v629_v44 = vsub.f32 %v322_v62, %v609_v43  ;;  %v636_v50 = vmul.f32 1.442695, %v628_v46 }
 0x250   :  { %v638_v47 = vmul.f32 1.442695, %v629_v44 }
 0x252   :  { %1561 = vpow2.f32 %v638_v47 }
 0x253   :  { %1563 = vpow2.f32 %v636_v50 }
 0x256   :  { %805 = vrot.lane.b32.xlu1 %v1805_v34, %s1658_s25 }
 0x25a   :  { %853 = vrot.lane.b32.xlu1 %v1807_v35, %s1658_s25 }
 0x25b   :  { %757 = vrot.lane.b32.xlu0 %v1785_v27, %s1658_s25 }
 0x25c   :  { %v1562_v51 = vpop.eup %1561 }
 0x25d   :  { %v655_v52 = vsel %vm235_vm2, %v1562_v51, 0.0  ;;  %v1876_v53 = vpop.eup %1563 }
 0x25e   :  { %v652_v34 = vsel %vm235_vm2, %v1876_v53, 0.0 }
 0x27a   :  { %656 = vadd.xlane.f32.xlu0 %v655_v52 }
 0x27e   :  { %653 = vadd.xlane.f32.xlu1 %v652_v34 }
 0x2c2   :  { %v612_v35 = vpop.xlane.xlu0 %611 }
 0x2c3   :  { %v630_v27 = vsub.f32 %v368_v6, %v612_v35 }
 0x2c5   :  { %v640_v54 = vmul.f32 1.442695, %v630_v27 }
 0x2c6   :  { %v615_v55 = vpop.xlane.xlu0 %614 }
 0x2c7   :  { %1565 = vpow2.f32 %v640_v54  ;;  %v631_v56 = vsub.f32 %v414_v7, %v615_v55 }
 0x2c9   :  { %v642_v57 = vmul.f32 1.442695, %v631_v56 }
 0x2ca   :  { %v621_v58 = vpop.xlane.xlu0 %620  ;;  %v618_v3 = vpop.xlane.xlu1 %617 }
 0x2cb   :  { %1567 = vpow2.f32 %v642_v57  ;;  %v632_v4 = vsub.f32 %v1859_v16, %v618_v3  ;;  %v633_v6 = vsub.f32 %v1861_v17, %v621_v58 }
 0x2cd   :  { %v644_v7 = vmul.f32 1.442695, %v632_v4  ;;  %v646_v9 = vmul.f32 1.442695, %v633_v6 }
 0x2cf   :  { %1569 = vpow2.f32 %v644_v7 }
 0x2d0   :  { %1571 = vpow2.f32 %v646_v9 }
 0x2d1   :  { %v1880_v59 = vpop.eup %1565 }
 0x2d2   :  { %v627_v60 = vpop.xlane.xlu0 %626  ;;  %v658_v61 = vsel %vm235_vm2, %v1880_v59, 0.0  ;;  %v624_v5 = vpop.xlane.xlu1 %623 }
 0x2d3   :  { %659 = vadd.xlane.f32.xlu1 %v658_v61  ;;  %v634_v8 = vsub.f32 %v552_v29, %v624_v5  ;;  %v635_v10 = vsub.f32 %v598_v30, %v627_v60 }
 0x2d5   :  { %v1884_v62 = vpop.eup %1567  ;;  %v648_v11 = vmul.f32 1.442695, %v634_v8  ;;  %v650_v12 = vmul.f32 1.442695, %v635_v10 }
 0x2d6   :  { %v758_v63 = vpop.permute.xlu0 %757  ;;  %v661_v0 = vsel %vm235_vm2, %v1884_v62, 0.0  ;;  %v806_v13 = vpop.permute.xlu1 %805 }
 0x2d7   :  { %v763_v2 = vsel %vm713_vm3, %v758_v63, 0  ;;  %662 = vadd.xlane.f32.xlu0 %v661_v0  ;;  %1573 = vpow2.f32 %v648_v11  ;;  %v811_v33 = vsel %vm713_vm3, %v806_v13, 0 }
 0x2d8   :  { %1494 = vmatpush3.bf16.msra.mxu1 %v763_v2  ;;  %1575 = vpow2.f32 %v650_v12 }
 0x2d9   :  { %1505 = vmatprep.subr.bf16.mxu1 %v1653_v1 }
 0x2da   :  { %v854_v14 = vpop.permute.xlu1 %853 }
 0x2db   :  { %v859_v30 = vsel %vm713_vm3, %v854_v14, 0 }
 0x2e4   :  { %949 = vrot.lane.b32.xlu1 %v1817_v41, %s1658_s25  ;;  %v1896_v41 = vpop.eup %1569 }
 0x2e5   :  { %v664_v16 = vsel %vm235_vm2, %v1896_v41, 0.0 }
 0x2ed   :  { %901 = vrot.lane.b32.xlu0 %v1815_v40, %s1658_s25  ;;  %v1898_v40 = vpop.eup %1571 }
 0x2ee   :  { %v1902_v17 = vpop.eup %1573  ;;  %v667_v19 = vsel %vm235_vm2, %v1898_v40, 0.0 }
 0x2ef   :  { %v670_v20 = vsel %vm235_vm2, %v1902_v17, 0.0  ;;  %v1908_v21 = vpop.eup %1575 }
 0x2f0   :  { %v673_v23 = vsel %vm235_vm2, %v1908_v21, 0.0 }
 0x307   :  { %v657_v15 = vpop.xlane.xlu0 %656 }
 0x308   :  { %1577 = vrcp.f32 %v657_v15  ;;  %665 = vadd.xlane.f32.xlu1 %v664_v16 }
 0x30b   :  { %v654_v18 = vpop.xlane.xlu1 %653 }
 0x30c   :  { %1579 = vrcp.f32 %v654_v18  ;;  %668 = vadd.xlane.f32.xlu0 %v667_v19  ;;  %671 = vadd.xlane.f32.xlu1 %v670_v20 }
 0x310   :  { %674 = vadd.xlane.f32.xlu0 %v673_v23 }
 0x312   :  { %v1578_v25 = vpop.eup %1577 }
 0x313   :  { %v685_v26 = vmul.f32 %v1578_v25, %v1562_v51 }
 0x315   :  { %693 = vst.msk [vmem:[#allocation4 + $0x8] sm:$0xff] %vm235_vm2, %v685_v26  ;;  %v701_v28 = vpack.c.bf16 %v685_v26, %v685_v26 }
 0x316   :  { %v1580_v29 = vpop.eup %1579 }
 0x317   :  { %v684_v31 = vmul.f32 %v1580_v29, %v1876_v53  ;;  %1496 = vmatmul.mubr.msk.bf16.vlgmr.msra.gmra.mrb[20].mxu1 %vm235_vm2, %v701_v28 }
 0x318   :  { %1506 = vmatpush3.bf16.msra.mxu1 %v859_v30  ;;  %1507 = vmatprep.mubr.msk.bf16.mxu1 %vm1654_vm0, %v1653_v1 }
 0x319   :  { %692 = vst.msk [vmem:[#allocation4] sm:$0xff] %vm235_vm2, %v684_v31  ;;  %v700_v32 = vpack.c.bf16 %v684_v31, %v684_v31  ;;  %1517 = vmatprep.subr.bf16.mxu1 %v1653_v1 }
 0x31b   :  { %1490 = vmatmul.mubr.msk.bf16.vlgmr.msra.gmra.mrb[20].mxu0 %vm235_vm2, %v700_v32 }
 0x31c   :  { %1500 = vmatpush3.bf16.msra.mxu0 %v811_v33  ;;  %1501 = vmatprep.mubr.msk.bf16.mxu0 %vm1654_vm0, %v1653_v1 }
 0x31d   :  { %1045 = vrot.lane.b32.xlu1 %v1833_v49, %s1658_s25  ;;  %1511 = vmatprep.subr.bf16.mxu0 %v1653_v1 }
 0x326   :  { %997 = vrot.lane.b32.xlu0 %v1831_v48, %s1658_s25 }
 0x360   :  { %v660_v36 = vpop.xlane.xlu1 %659 }
 0x361   :  { %1581 = vrcp.f32 %v660_v36 }
 0x364   :  { %v663_v37 = vpop.xlane.xlu0 %662  ;;  %v950_v46 = vpop.permute.xlu1 %949 }
 0x365   :  { %1583 = vrcp.f32 %v663_v37  ;;  %v955_v47 = vsel %vm713_vm3, %v950_v46, 0 }
 0x368   :  { %v902_v42 = vpop.permute.xlu0 %901 }
 0x369   :  { %v907_v49 = vsel %vm713_vm3, %v902_v42, 0 }
 0x36b   :  { %v1582_v38 = vpop.eup %1581 }
 0x36c   :  { %v686_v39 = vmul.f32 %v1582_v38, %v1880_v59 }
 0x36e   :  { %694 = vst.msk [vmem:[#allocation4 + $0x10] sm:$0xff] %vm235_vm2, %v686_v39  ;;  %v702_v43 = vpack.c.bf16 %v686_v39, %v686_v39 }
 0x36f   :  { %v1584_v44 = vpop.eup %1583 }
 0x370   :  { %v687_v45 = vmul.f32 %v1584_v44, %v1884_v62  ;;  %1502 = vmatmul.mubr.msk.bf16.vlgmr.msra.gmra.mrb[24].mxu0 %vm235_vm2, %v702_v43 }
 0x371   :  { %1512 = vmatpush3.bf16.msra.mxu0 %v907_v49  ;;  %1513 = vmatprep.mubr.msk.bf16.mxu0 %vm1654_vm0, %v1653_v1 }
 0x372   :  { %695 = vst.msk [vmem:[#allocation4 + $0x18] sm:$0xff] %vm235_vm2, %v687_v45  ;;  %v703_v48 = vpack.c.bf16 %v687_v45, %v687_v45  ;;  %1523 = vmatprep.subr.bf16.mxu0 %v1653_v1 }
 0x374   :  { %1508 = vmatmul.mubr.msk.bf16.vlgmr.msra.gmra.mrb[24].mxu1 %vm235_vm2, %v703_v48 }
 0x375   :  { %1518 = vmatpush3.bf16.msra.mxu1 %v955_v47  ;;  %1519 = vmatprep.mubr.msk.bf16.mxu1 %vm1654_vm0, %v1653_v1 }
 0x376   :  { %1529 = vmatprep.subr.bf16.mxu1 %v1653_v1 }
 0x395   :  { %v666_v50 = vpop.xlane.xlu1 %665 }
 0x396   :  { %1585 = vrcp.f32 %v666_v50 }
 0x399   :  { %v669_v51 = vpop.xlane.xlu0 %668  ;;  %v672_v52 = vpop.xlane.xlu1 %671 }
 0x39a   :  { %1587 = vrcp.f32 %v669_v51 }
 0x39b   :  { %1589 = vrcp.f32 %v672_v52 }
 0x39d   :  { %v675_v53 = vpop.xlane.xlu0 %674  ;;  %v1046_v60 = vpop.permute.xlu1 %1045 }
 0x39e   :  { %1591 = vrcp.f32 %v675_v53  ;;  %v1051_v0 = vsel %vm713_vm3, %v1046_v60, 0 }
 0x3a0   :  { %v1586_v34 = vpop.eup %1585 }
 0x3a1   :  { %v688_v35 = vmul.f32 %v1586_v34, %v1896_v41  ;;  %v998_v27 = vpop.permute.xlu0 %997 }
 0x3a2   :  { %v1003_v58 = vsel %vm713_vm3, %v998_v27, 0 }
 0x3a3   :  { %696 = vst.msk [vmem:[#allocation4 + $0x20] sm:$0xff] %vm235_vm2, %v688_v35  ;;  %v704_v54 = vpack.c.bf16 %v688_v35, %v688_v35 }
 0x3a4   :  { %v1588_v55 = vpop.eup %1587 }
 0x3a5   :  { %v1590_v56 = vpop.eup %1589  ;;  %v689_v57 = vmul.f32 %v1588_v55, %v1898_v40  ;;  %1514 = vmatmul.mubr.msk.bf16.vlgmr.msra.gmra.mrb[28].mxu0 %vm235_vm2, %v704_v54 }
 0x3a6   :  { %v690_v59 = vmul.f32 %v1590_v56, %v1902_v17  ;;  %1524 = vmatpush3.bf16.msra.mxu0 %v1003_v58  ;;  %1525 = vmatprep.mubr.msk.bf16.mxu0 %vm1654_vm0, %v1653_v1 }
 0x3a7   :  { %697 = vst.msk [vmem:[#allocation4 + $0x28] sm:$0xff] %vm235_vm2, %v689_v57  ;;  %v705_v61 = vpack.c.bf16 %v689_v57, %v689_v57  ;;  %1535 = vmatprep.subr.bf16.mxu0 %v1653_v1 }
 0x3a8   :  { %v1592_v62 = vpop.eup %1591  ;;  %698 = vst.msk [vmem:[#allocation4 + $0x30] sm:$0xff] %vm235_vm2, %v690_v59  ;;  %v706_v2 = vpack.c.bf16 %v690_v59, %v690_v59 }
 0x3a9   :  { %v691_v63 = vmul.f32 %v1592_v62, %v1908_v21  ;;  %1520 = vmatmul.mubr.msk.bf16.vlgmr.msra.gmra.mrb[28].mxu1 %vm235_vm2, %v705_v61 }
 0x3aa   :  { %1530 = vmatpush3.bf16.msra.mxu1 %v1051_v0  ;;  %1531 = vmatprep.mubr.msk.bf16.mxu1 %vm1654_vm0, %v1653_v1 }
 0x3ab   :  { %699 = vst.msk [vmem:[#allocation4 + $0x38] sm:$0xff] %vm235_vm2, %v691_v63  ;;  %v707_v3 = vpack.c.bf16 %v691_v63, %v691_v63  ;;  %v1560_v63 = vld [vmem:[%s2039_s6 + $0x8] sm:$0xff]  }
 0x3ad   :  { %1526 = vmatmul.mubr.msk.bf16.vlgmr.msra.gmra.mrb[32].mxu0 %vm235_vm2, %v706_v2 }
 0x3ae   :  { %1539 = vmatprep.mubr.msk.bf16.mxu0 %vm1654_vm0, %v1653_v1 }
 0x3b1   :  { %1532 = vmatmul.mubr.msk.bf16.vlgmr.msra.gmra.mrb[32].mxu1 %vm235_vm2, %v707_v3 }
 0x3ea   :  { %v799_v4 = vpop.f32.mrb[20].mxu1 }
 0x3eb   :  { %v1497_v5 = vpop.f32.mrb[21].mxu1 }
 0x3ec   :  { %v802_v6 = vpop.f32.mrb[22].mxu1 }
 0x3ed   :  { %v1498_v7 = vpop.f32.mrb[23].mxu1 }
 0x3ee   :  { %v751_v8 = vpop.f32.mrb[20].mxu0 }
 0x3ef   :  { %v1491_v9 = vpop.f32.mrb[21].mxu0 }
 0x3f0   :  { %v754_v10 = vpop.f32.mrb[22].mxu0  ;;  %v1370_v9 = vld [vmem:[%s2041_s8] ss:$0 sm:$0xff] }
 0x3f1   :  { %v1492_v11 = vpop.f32.mrb[23].mxu0 }
 0x443   :  { %v847_v12 = vpop.f32.mrb[24].mxu0 }
 0x444   :  { %1095 = vrot.lane.b32.xlu0 %v847_v12, %s1659_s26  ;;  %v1503_v13 = vpop.f32.mrb[25].mxu0 }
 0x445   :  { %v850_v41 = vpop.f32.mrb[26].mxu0 }
 0x446   :  { %v1504_v40 = vpop.f32.mrb[27].mxu0 }
 0x447   :  { %v895_v14 = vpop.f32.mrb[24].mxu1 }
 0x448   :  { %1097 = vrot.lane.b32.xlu1 %v895_v14, %s1659_s26  ;;  %v1509_v15 = vpop.f32.mrb[25].mxu1 }
 0x449   :  { %v898_v16 = vpop.f32.mrb[26].mxu1  ;;  %v1372_v15 = vld [vmem:[%s2040_s7] ss:$0 sm:$0xff]  ;;  %s1662_s7 = smov [#allocation4]  }
 0x44a   :  { %v1510_v17 = vpop.f32.mrb[27].mxu1  ;;  %s1315_s8 = sshll.u32 %s1662_s7, 4  ;;  %s1316_s8 = int_to_ptr.vmem [resolvable:$true] %s1315_s8 }
 0x44b   :  { %p1610_p1 = scmp.lt.s32.totalorder %s1316_s8, %s1316_s8 }
 0x478   :  { %v943_v18 = vpop.f32.mrb[28].mxu0 }
 0x479   :  { %1103 = vrot.lane.b32.xlu0 %v943_v18, %s1660_s27  ;;  %v1515_v19 = vpop.f32.mrb[29].mxu0 }
 0x47a   :  { %v946_v20 = vpop.f32.mrb[30].mxu0 }
 0x47b   :  { %v1516_v21 = vpop.f32.mrb[31].mxu0 }
 0x47c   :  { %v991_v23 = vpop.f32.mrb[28].mxu1 }
 0x47d   :  { %1105 = vrot.lane.b32.xlu1 %v991_v23, %s1660_s27  ;;  %v1521_v25 = vpop.f32.mrb[29].mxu1 }
 0x47e   :  { %v994_v26 = vpop.f32.mrb[30].mxu1 }
 0x47f   :  { %v1522_v28 = vpop.f32.mrb[31].mxu1 }
 0x480   :  { %v1039_v29 = vpop.f32.mrb[32].mxu0 }
 0x481   :  { %1111 = vrot.lane.b32.xlu0 %v1039_v29, %s1661_s28  ;;  %v1527_v30 = vpop.f32.mrb[33].mxu0 }
 0x482   :  { %v1042_v31 = vpop.f32.mrb[34].mxu0 }
 0x483   :  { %v1528_v32 = vpop.f32.mrb[35].mxu0 }
 0x484   :  { %v1087_v33 = vpop.f32.mrb[32].mxu1 }
 0x485   :  { %1113 = vrot.lane.b32.xlu1 %v1087_v33, %s1661_s28  ;;  %v1533_v36 = vpop.f32.mrb[33].mxu1 }
 0x486   :  { %v1090_v37 = vpop.f32.mrb[34].mxu1 }
 0x487   :  { %v1534_v38 = vpop.f32.mrb[35].mxu1 }
 0x4b6   :  { %v1096_v39 = vpop.permute.xlu0 %1095 }
 0x4b7   :  { %v1117_v44 = vsel %vm235_vm2, %v751_v8, %v1096_v39 }
 0x4ba   :  { %v1098_v42 = vpop.permute.xlu1 %1097 }
 0x4bb   :  { %v1118_v50 = vsel %vm235_vm2, %v799_v4, %v1098_v42 }
 0x4eb   :  { %v1104_v43 = vpop.permute.xlu0 %1103 }
 0x4ec   :  { %v1120_v45 = vsel %vm1119_vm4, %v1117_v44, %v1104_v43 }
 0x4ef   :  { %v1106_v49 = vpop.permute.xlu1 %1105 }
 0x4f0   :  { %v1121_v51 = vsel %vm1119_vm4, %v1118_v50, %v1106_v49 }
 0x4f3   :  { %v1112_v46 = vpop.permute.xlu0 %1111 }
 0x4f4   :  { %v1123_v48 = vsel %vm1122_vm5, %v1120_v45, %v1112_v46 }
 0x4f5   :  { %v1125_v47 = vadd.f32 %v1123_v48, %v1781_v22 }
 0x4f7   :  { %v1114_v52 = vpop.permute.xlu1 %1113  ;;  %v1129_v53 = vsel %vm75_vm1, %v1125_v47, 0.0 }
 0x4f8   :  { %v1124_v34 = vsel %vm1122_vm5, %v1121_v51, %v1114_v52  ;;  %1130 = vadd.xlane.f32.xlu0 %v1129_v53 }
 0x4f9   :  { %v1126_v35 = vadd.f32 %v1124_v34, %v1783_v24  ;;  %v1559_v24 = vld [vmem:[%s2039_s6] sm:$0xff]  }
 0x4fa   :  { %1536 = vmatpush3.bf16.msra.mxu0 %v1559_v24 }
 0x4fb   :  { %v1132_v27 = vsel %vm75_vm1, %v1126_v35, 0.0  ;;  %1537 = vmatprep.subr.bf16.mxu0 %v1653_v1  ;;  %v1371_v1 = vld [vmem:[%s2042_s9] ss:$0 sm:$0xff]  ;;  %s1605_s9 = scalar_lea.vmem %s1316_s8, 1024 }
 0x4fc   :  { %1133 = vadd.xlane.f32.xlu1 %v1132_v27  ;;  %p1606_p0 = scmp.ne.s32.totalorder %s1316_s8, %s1605_s9  ;;  %p1611_p2 = scmp.lt.s32.totalorder %s1605_s9, %s1605_s9 }
 0x4fe   :  { %1538 = vmatpush3.bf16.msra.mxu0 %v1560_v63  ;;  %p1612_p3 = por %p1611_p2, %p1610_p1 }
 0x500   :  { %p1613_p4 = pnand %p1612_p3, %p1606_p0 }
 0x585   :  { %v1131_v54 = vpop.xlane.xlu0 %1130 }
 0x586   :  { %v1136_v55 = vmul.f32 0.03125, %v1131_v54 }
 0x588   :  { %v1138_v56 = vsub.f32 %v1125_v47, %v1136_v55 }
 0x589   :  { %v1134_v57 = vpop.xlane.xlu1 %1133 }
 0x58a   :  { %v1137_v58 = vmul.f32 0.03125, %v1134_v57  ;;  %v1140_v59 = vmul.f32 %v1138_v56, %v1138_v56 }
 0x58c   :  { %v1139_v22 = vsub.f32 %v1126_v35, %v1137_v58  ;;  %v1142_v60 = vsel %vm75_vm1, %v1140_v59, 0.0 }
 0x58d   :  { %1143 = vadd.xlane.f32.xlu0 %v1142_v60 }
 0x58e   :  { %v1141_v61 = vmul.f32 %v1139_v22, %v1139_v22 }
 0x590   :  { %v1145_v62 = vsel %vm75_vm1, %v1141_v61, 0.0 }
 0x591   :  { %1146 = vadd.xlane.f32.xlu0 %v1145_v62 }
 0x61a   :  { %v1144_v0 = vpop.xlane.xlu0 %1143 }
 0x61b   :  { %v1148_v2 = vmul.f32 0.03125, %v1144_v0 }
 0x61d   :  { %v1150_v3 = vadd.f32 1e-05, %v1148_v2 }
 0x61e   :  { %v1147_v4 = vpop.xlane.xlu0 %1146 }
 0x61f   :  { %1593 = vrsqrt.f32 %v1150_v3  ;;  %v1149_v5 = vmul.f32 0.03125, %v1147_v4 }
 0x621   :  { %v1151_v6 = vadd.f32 1e-05, %v1149_v5 }
 0x623   :  { %1595 = vrsqrt.f32 %v1151_v6 }
 0x629   :  { %v1594_v7 = vpop.eup %1593 }
 0x62a   :  { %v1154_v8 = vmul.f32 %v1594_v7, %v1138_v56 }
 0x62c   :  { %v1162_v11 = vmul.f32 %v1370_v9, %v1154_v8 }
 0x62d   :  { %v1596_v10 = vpop.eup %1595 }
 0x62e   :  { %v1155_v12 = vmul.f32 %v1596_v10, %v1139_v22  ;;  %v1170_v41 = vadd.f32 %v1371_v1, %v1162_v11 }
 0x630   :  { %v1163_v13 = vmul.f32 %v1370_v9, %v1155_v12 }
 0x632   :  { %v1171_v40 = vadd.f32 %v1371_v1, %v1163_v13 }
 0x634   :  { %v1172_v14 = vpack.c.bf16 %v1171_v40, %v1170_v41 }
 0x636   :  { %1540 = vmatmul.mubr.msk.bf16.vlgmr.msra.gmra.mrb[36].mxu0 %vm75_vm1, %v1172_v14 }
 0x709   :  { %v1233_v16 = vpop.f32.mrb[36].mxu0 }
 0x70a   :  { %v1234_v17 = vadd.f32 %v1372_v15, %v1233_v16  ;;  %v1541_v18 = vpop.f32.mrb[37].mxu0 }
 0x70b   :  { %v1236_v19 = vpop.f32.mrb[38].mxu0 }
 0x70c   :  { %v1242_v20 = vmul.f32 0.70710677, %v1234_v17  ;;  %v1237_v21 = vadd.f32 %v1372_v15, %v1236_v19  ;;  %v1542_v23 = vpop.f32.mrb[39].mxu0  ;;  %v1240_v28 = vmul.f32 0.5, %v1234_v17 }
 0x70e   :  { %1597 = verf.f32 %v1242_v20  ;;  %v1243_v25 = vmul.f32 0.70710677, %v1237_v21  ;;  %v1241_v31 = vmul.f32 0.5, %v1237_v21 }
 0x710   :  { %1599 = verf.f32 %v1243_v25 }
 0x718   :  { %v1598_v26 = vpop.eup %1597 }
 0x719   :  { %v1246_v29 = vadd.f32 1.0, %v1598_v26 }
 0x71a   :  { %v1600_v30 = vpop.eup %1599 }
 0x71b   :  { %v1247_v32 = vadd.f32 1.0, %v1600_v30  ;;  %v1248_v33 = vmul.f32 %v1246_v29, %v1240_v28 }
 0x71d   :  { %v1250_v36 = vadd.f32 %v1248_v33, %v1170_v41  ;;  %v1249_v37 = vmul.f32 %v1247_v32, %v1241_v31 }
 0x71f   :  { %v1254_v38 = vsel %vm75_vm1, %v1250_v36, 0.0  ;;  %v1251_v39 = vadd.f32 %v1249_v37, %v1171_v40 }
 0x720   :  { %1255 = vadd.xlane.f32.xlu1 %v1254_v38 }
 0x721   :  { %v1257_v42 = vsel %vm75_vm1, %v1251_v39, 0.0 }
 0x722   :  { %1258 = vadd.xlane.f32.xlu0 %v1257_v42 }
 0x7ad   :  { %v1256_v43 = vpop.xlane.xlu1 %1255 }
 0x7ae   :  { %v1260_v44 = vmul.f32 0.03125, %v1256_v43 }
 0x7af   :  { %v1259_v45 = vpop.xlane.xlu0 %1258 }
 0x7b0   :  { %v1262_v49 = vsub.f32 %v1250_v36, %v1260_v44  ;;  %v1261_v46 = vmul.f32 0.03125, %v1259_v45 }
 0x7b2   :  { %v1263_v48 = vsub.f32 %v1251_v39, %v1261_v46  ;;  %v1264_v47 = vmul.f32 %v1262_v49, %v1262_v49 }
 0x7b4   :  { %v1266_v50 = vsel %vm75_vm1, %v1264_v47, 0.0  ;;  %v1265_v51 = vmul.f32 %v1263_v48, %v1263_v48 }
 0x7b5   :  { %1267 = vadd.xlane.f32.xlu1 %v1266_v50 }
 0x7b6   :  { %v1269_v52 = vsel %vm75_vm1, %v1265_v51, 0.0 }
 0x7b7   :  { %1270 = vadd.xlane.f32.xlu0 %v1269_v52 }
 0x7b8   :  { %1616 = shalt.err (!%p1613_p4)
}
 0x7b9   :  { %s1617_s22 = scalar_lea.hbm %s2046_s13, 1024 }
 0x7ba   :  { %p1618_p5 = scmp.ne.s32.totalorder %s2046_s13, %s1617_s22  ;;  %p1621_p6 = scmp.lt.u32.totalorder %s1617_s22, %s2046_s13 }
 0x7bc   :  { %p1623_p7 = pnand %p1621_p6, %p1618_p5 }
 0x7be   :  { %1626 = shalt.err (!%p1623_p7)
}
 0x7bf   :  { %s1663_s3 = smov 128   ;;  %v1376_v57 = vld [vmem:[%s2043_s10] ss:$0 sm:$0xff] }
 0x7c0   :  { %1321 = dma.vmem_to_hbm [thread:$0]  %s1316_s8, 1024, %s2046_s13, [#allocation5], %s1663_s3, %s1663_s3, %s1659_s26  }
 0x7c1   :  { %v1377_v22 = vld [vmem:[%s2044_s11] ss:$0 sm:$0xff]  ;;  %s1664_s13 = smov [#allocation2]  }
 0x7c2   :  { %s1303_s30 = sshll.u32 %s1664_s13, 4  ;;  %s1304_s30 = int_to_ptr.vmem [resolvable:$true] %s1303_s30 }
 0x7c3   :  { %s1627_s14 = scalar_lea.vmem %s1304_s30, 256  ;;  %p1632_p9 = scmp.lt.s32.totalorder %s1304_s30, %s1304_s30 }
 0x7c4   :  { %p1628_p8 = scmp.ne.s32.totalorder %s1304_s30, %s1627_s14  ;;  %p1633_p10 = scmp.lt.s32.totalorder %s1627_s14, %s1627_s14 }
 0x7c6   :  { %p1634_p11 = por %p1633_p10, %p1632_p9 }
 0x7c8   :  { %p1635_p12 = pnand %p1634_p11, %p1628_p8 }
 0x842   :  { %v1268_v53 = vpop.xlane.xlu1 %1267 }
 0x843   :  { %v1272_v34 = vmul.f32 0.03125, %v1268_v53 }
 0x844   :  { %v1271_v35 = vpop.xlane.xlu0 %1270 }
 0x845   :  { %v1274_v27 = vadd.f32 1e-05, %v1272_v34  ;;  %v1273_v54 = vmul.f32 0.03125, %v1271_v35 }
 0x847   :  { %1601 = vrsqrt.f32 %v1274_v27  ;;  %v1275_v55 = vadd.f32 1e-05, %v1273_v54 }
 0x849   :  { %1603 = vrsqrt.f32 %v1275_v55 }
 0x851   :  { %v1602_v56 = vpop.eup %1601 }
 0x852   :  { %v1278_v58 = vmul.f32 %v1602_v56, %v1262_v49 }
 0x853   :  { %v1604_v59 = vpop.eup %1603 }
 0x854   :  { %v1279_v60 = vmul.f32 %v1604_v59, %v1263_v48  ;;  %v1286_v61 = vmul.f32 %v1376_v57, %v1278_v58 }
 0x856   :  { %v1287_v62 = vmul.f32 %v1376_v57, %v1279_v60  ;;  %v1294_v24 = vadd.f32 %v1377_v22, %v1286_v61 }
 0x858   :  { %v1295_v63 = vadd.f32 %v1377_v22, %v1287_v62  ;;  %1296 = vst.msk [vmem:[#allocation2] sm:$0xff] %vm75_vm1, %v1294_v24 }
 0x85a   :  { %1297 = vst.msk [vmem:[#allocation2 + $0x8] sm:$0xff] %vm75_vm1, %v1295_v63 }
 0x85b   :  { %1638 = shalt.err (!%p1635_p12)
}
 0x85c   :  { %s1639_s15 = scalar_lea.hbm %s2045_s12, 256 }
 0x85d   :  { %p1640_p13 = scmp.ne.s32.totalorder %s2045_s12, %s1639_s15  ;;  %p1643_p0 = scmp.lt.u32.totalorder %s1639_s15, %s2045_s12 }
 0x85f   :  { %p1645_p1 = pnand %p1643_p0, %p1640_p13 }
 0x861   :  { %1648 = shalt.err (!%p1645_p1)
}
 0x862   :  { %1309 = dma.vmem_to_hbm [thread:$0]  %s1304_s30, 256, %s2045_s12, [#allocation3], %s1663_s3, %s1663_s3, %s1659_s26  }
 0x863   :  { %1649 = dma.done.wait [#allocation3], 256  }
 0x864   :  { %1650 = vsyncadd [#allocation3], 4294967040 }
 0x865   :  { %1651 = dma.done.wait [#allocation5], 1024  }
 0x866   :  { %1652 = vsyncadd [#allocation5], 4294966272 }
 0x867   :  { %1328 = vsyncpa [#allocation3], 1 }
 0x868   :  { %1329 = vsyncpa [#allocation5], 1 }

</bundles_post_ra>
